<compile_context>
chip_gen: v7x
topology: tpu7x:2x2x1
jax: 0.10.0
libtpu: 0.0.40
codegen_flags: <defaults>
</compile_context>

<pallas_src>
import jax
import jax.numpy as jnp
from jax.experimental import pallas as pl
from jax.experimental.pallas import tpu as pltpu


def qnet_kernel(xT_ref, w1T_ref, b1_ref, w2T_ref, b2_ref, o_ref):
    # h^T = W1^T @ x^T : (64, 4) @ (4, TB) -> (64, TB)   (batch on lanes)
    h = jnp.dot(w1T_ref[...], xT_ref[...], preferred_element_type=jnp.float32)
    h = h + b1_ref[...]                      # (64, TB) + (64, 1) broadcast over lanes
    h = jnp.maximum(h, 0.0)                  # ReLU
    # q^T = W2^T @ h^T : (1, 64) @ (64, TB) -> (1, TB)   (lane-dense output)
    q = jnp.dot(w2T_ref[...], h, preferred_element_type=jnp.float32)
    q = q + b2_ref[0, 0]                     # scalar bias from SMEM
    o_ref[...] = q.astype(o_ref.dtype)


def simple_qnetwork_forward(x, w1, b1, w2, b2, *, tb=2048):
    """x: (B, 4), w1: (4, 64), b1: (64,), w2: (64, 1), b2: (1,) -> (B, 1)."""
    B, f_in = x.shape
    f_hid = w1.shape[1]
    f_out = w2.shape[1]
    itemsize = jnp.dtype(x.dtype).itemsize

    # Lane tile for the batch axis: multiple of 128, but don't over-pad tiny batches.
    tb = min(tb, pl.cdiv(B, 128) * 128)
    b_pad = pl.cdiv(B, tb) * tb
    grid = (b_pad // tb,)

    # Batch-on-lanes layout + zero padding of the tail tile (XLA fuses transpose+pad).
    xT = jnp.pad(x.T, ((0, 0), (0, b_pad - B)))          # (F_IN, B_pad)
    w1T = w1.T                                           # (64, 4)
    b1c = b1.reshape(f_hid, 1).astype(jnp.float32)       # (64, 1)
    w2T = w2.T                                           # (1, 64)
    b2s = b2.reshape(1, 1).astype(jnp.float32)           # (1, 1) scalar -> SMEM

    cost = pl.CostEstimate(
        flops=2 * b_pad * (f_in * f_hid + f_hid * f_out),
        transcendentals=0,
        bytes_accessed=(f_in * b_pad + f_out * b_pad
                        + f_hid * f_in + f_hid + f_out * f_hid + 1) * itemsize,
    )

    qT = pl.pallas_call(
        qnet_kernel,
        out_shape=jax.ShapeDtypeStruct((f_out, b_pad), x.dtype),
        grid=grid,
        in_specs=[
            pl.BlockSpec((f_in, tb), lambda i: (0, i)),          # x^T: streamed per tile
            pl.BlockSpec((f_hid, f_in), lambda i: (0, 0)),       # W1^T: VMEM-resident
            pl.BlockSpec((f_hid, 1), lambda i: (0, 0)),          # b1:   VMEM-resident
            pl.BlockSpec((f_out, f_hid), lambda i: (0, 0)),      # W2^T: VMEM-resident
            pl.BlockSpec(memory_space=pltpu.MemorySpace.SMEM),   # b2:   scalar in SMEM
        ],
        out_specs=pl.BlockSpec((f_out, tb), lambda i: (0, i)),   # lane-dense (1, TB)
        compiler_params=pltpu.CompilerParams(
            dimension_semantics=("parallel",),
            vmem_limit_bytes=32 * 1024 * 1024,
        ),
        cost_estimate=cost,
    )(xT, w1T, b1c, w2T, b2s)

    # Back to the module's (B, 1) output, dropping batch padding.
    return qT[:, :B].T


def xavier_uniform(key, fan_in, fan_out, dtype=jnp.float32):
    # Matches torch.nn.init.xavier_uniform_ bound: sqrt(6 / (fan_in + fan_out)).
    limit = (6.0 / (fan_in + fan_out)) ** 0.5
    # Stored as (fan_in, fan_out) so forward is x @ W (== PyTorch x @ W^T).
    return jax.random.uniform(key, (fan_in, fan_out), dtype, -limit, limit)


if __name__ == "__main__":
    key = jax.random.PRNGKey(0)
    k_x1, k_x2, k_w1, k_w2 = jax.random.split(key, 4)

    F_IN, F_HID, F_OUT = 4, 64, 1

    w1 = xavier_uniform(k_w1, F_IN, F_HID)              # (4, 64)
    b1 = jnp.zeros((F_HID,), jnp.float32)               # nn.init.constant_(bias, 0)
    w2 = xavier_uniform(k_w2, F_HID, F_OUT)             # (64, 1)
    b2 = jnp.zeros((F_OUT,), jnp.float32)

    def ref_fwd(x):
        return jnp.maximum(x @ w1 + b1, 0.0) @ w2 + b2

    # Small batch (exercises padding of a partial lane tile).
    x_small = jax.random.normal(k_x1, (8, F_IN), jnp.float32)
    out_small = jax.block_until_ready(simple_qnetwork_forward(x_small, w1, b1, w2, b2))
    assert out_small.shape == (8, F_OUT)
    assert jnp.allclose(out_small, ref_fwd(x_small), atol=1e-4, rtol=1e-4)

    # Larger batch (exercises a multi-column tile + tail handling).
    x_big = jax.random.normal(k_x2, (640, F_IN), jnp.float32)
    out_big = jax.block_until_ready(simple_qnetwork_forward(x_big, w1, b1, w2, b2))
    assert out_big.shape == (640, F_OUT)
    assert jnp.allclose(out_big, ref_fwd(x_big), atol=1e-4, rtol=1e-4)

    print("KERNEL_OK")
</pallas_src>

<mosaic_0001>
module attributes {stable_mosaic.version = 11 : i64} {
  func.func @qnet_kernel(%arg0: i32, %arg1: memref<4x128xf32, #tpu.memory_space<vmem>>, %arg2: memref<64x4xf32, #tpu.memory_space<vmem>>, %arg3: memref<64x1xf32, #tpu.memory_space<vmem>>, %arg4: memref<1x64xf32, #tpu.memory_space<vmem>>, %arg5: memref<1x1xf32, #tpu.memory_space<smem>>, %arg6: memref<1x128xf32, #tpu.memory_space<vmem>>) attributes {dimension_semantics = [#tpu.dimension_semantics<parallel>], iteration_bounds = array<i64: 1>, scalar_prefetch = 0 : i64, scratch_operands = 0 : i64, tpu.core_type = #tpu.core_type<tc>, window_params = [{transform_indices = @transform_0, window_bounds = array<i64: 4, 128>}, {pipeline_mode = #tpu.pipeline_mode<synchronous>, transform_indices = @transform_1, window_bounds = array<i64: 64, 4>}, {pipeline_mode = #tpu.pipeline_mode<synchronous>, transform_indices = @transform_2, window_bounds = array<i64: 64, 1>}, {pipeline_mode = #tpu.pipeline_mode<synchronous>, transform_indices = @transform_3, window_bounds = array<i64: 1, 64>}, {transform_indices = @transform_4, window_bounds = array<i64: 1, 1>}, {transform_indices = @transform_5, window_bounds = array<i64: 1, 128>}]} {
    %c0 = arith.constant 0 : index
    %c0_0 = arith.constant 0 : index
    %0 = vector.load %arg2[%c0, %c0_0] : memref<64x4xf32, #tpu.memory_space<vmem>>, vector<64x4xf32>
    %c0_1 = arith.constant 0 : index
    %c0_2 = arith.constant 0 : index
    %1 = vector.load %arg1[%c0_1, %c0_2] : memref<4x128xf32, #tpu.memory_space<vmem>>, vector<4x128xf32>
    %cst = arith.constant dense<0.000000e+00> : vector<64x128xf32>
    %2 = tpu.matmul %0, %1, %cst {dimension_numbers = #tpu.dot_dimension_numbers<[1], [0], [0], [1], [0, 0, 1, 1], [], []>} : vector<64x4xf32>, vector<4x128xf32>, vector<64x128xf32> -> vector<64x128xf32>
    %c0_3 = arith.constant 0 : index
    %c0_4 = arith.constant 0 : index
    %3 = vector.load %arg3[%c0_3, %c0_4] : memref<64x1xf32, #tpu.memory_space<vmem>>, vector<64x1xf32>
    %4 = vector.broadcast %3 : vector<64x1xf32> to vector<64x128xf32>
    %5 = arith.addf %2, %4 : vector<64x128xf32>
    %cst_5 = arith.constant 0.000000e+00 : f32
    %6 = vector.broadcast %cst_5 : f32 to vector<64x128xf32>
    %7 = arith.maximumf %5, %6 : vector<64x128xf32>
    %c0_6 = arith.constant 0 : index
    %c0_7 = arith.constant 0 : index
    %8 = vector.load %arg4[%c0_6, %c0_7] : memref<1x64xf32, #tpu.memory_space<vmem>>, vector<1x64xf32>
    %cst_8 = arith.constant dense<0.000000e+00> : vector<1x128xf32>
    %9 = tpu.matmul %8, %7, %cst_8 {dimension_numbers = #tpu.dot_dimension_numbers<[1], [0], [0], [1], [0, 0, 1, 1], [], []>} : vector<1x64xf32>, vector<64x128xf32>, vector<1x128xf32> -> vector<1x128xf32>
    %c0_9 = arith.constant 0 : index
    %c0_10 = arith.constant 0 : index
    %10 = memref.load %arg5[%c0_9, %c0_10] : memref<1x1xf32, #tpu.memory_space<smem>>
    %11 = vector.broadcast %10 : f32 to vector<1x128xf32>
    %12 = arith.addf %9, %11 : vector<1x128xf32>
    %c0_11 = arith.constant 0 : index
    %c0_12 = arith.constant 0 : index
    %13 = vector.load %arg6[%c0_11, %c0_12] : memref<1x128xf32, #tpu.memory_space<vmem>>, vector<1x128xf32>
    tpu.vector_store %arg6[%c0_11, %c0_12], %12 {strides = array<i32>} : memref<1x128xf32, #tpu.memory_space<vmem>>, vector<1x128xf32>,
    return
  }
  func.func @transform_0(%arg0: i32) -> (i32, i32) {
    %c0_i32 = arith.constant 0 : i32
    %c0_i32_0 = arith.constant 0 : i32
    return %c0_i32, %arg0 : i32, i32
  }
  func.func @transform_1(%arg0: i32) -> (i32, i32) {
    %c0_i32 = arith.constant 0 : i32
    %c0_i32_0 = arith.constant 0 : i32
    %c0_i32_1 = arith.constant 0 : i32
    return %c0_i32, %c0_i32_0 : i32, i32
  }
  func.func @transform_2(%arg0: i32) -> (i32, i32) {
    %c0_i32 = arith.constant 0 : i32
    %c0_i32_0 = arith.constant 0 : i32
    %c0_i32_1 = arith.constant 0 : i32
    return %c0_i32, %c0_i32_0 : i32, i32
  }
  func.func @transform_3(%arg0: i32) -> (i32, i32) {
    %c0_i32 = arith.constant 0 : i32
    %c0_i32_0 = arith.constant 0 : i32
    %c0_i32_1 = arith.constant 0 : i32
    return %c0_i32, %c0_i32_0 : i32, i32
  }
  func.func @transform_4(%arg0: i32) -> (i32, i32) {
    %c0_i32 = arith.constant 0 : i32
    %c0_i32_0 = arith.constant 0 : i32
    %c0_i32_1 = arith.constant 0 : i32
    return %c0_i32, %c0_i32_0 : i32, i32
  }
  func.func @transform_5(%arg0: i32) -> (i32, i32) {
    %c0_i32 = arith.constant 0 : i32
    %c0_i32_0 = arith.constant 0 : i32
    return %c0_i32, %arg0 : i32, i32
  }
}

</mosaic_0001>

<bundles_post_ra>
// kernel: tpu_custom_call.1
= control target key start
LH: loop header
LB: loop body
LE: loop exit
PB: predicated region body
PF: predicated region fallthrough
CT: control target
= control target key end

     0   :  { %vm104_vm0 = vcmask 1043456   ;;  %vm79_vm1 = vcmask 31744   ;;  %v417_v4 = vmov 0   ;;  %s529_s0 = inlined_call_operand.vmem [shape: f32[4,128], index: 0, kind: input, shape index: {}]   ;;  %s530_s1 = inlined_call_operand.vmem [shape: f32[64,4], index: 1, kind: input, shape index: {}]   ;;  %s531_s2 = inlined_call_operand.vmem [shape: f32[64,1], index: 2, kind: input, shape index: {}]   ;;  %s532_s3 = inlined_call_operand.vmem [shape: f32[1,64], index: 3, kind: input, shape index: {}]   ;;  %s533_s4 = inlined_call_operand.<no memory space> [shape: f32[1,1], index: 4, kind: input, shape index: {}]   ;;  %s534_s5 = inlined_call_operand.hbm [shape: f32[1,128], index: 5, kind: output, shape index: {}]  }
   0x1   :  { %v30_v0 = vld [vmem:[%s529_s0] sm:$0xf]  ;;  %v23_v2 = vld [vmem:[%s530_s1 + $0x8] sm:$0xff]  ;;  %v24_v3 = vld [vmem:[%s530_s1 + $0x10] sm:$0xff]  ;;  %391 = vset.pattern.permute.xlu0 %v417_v4  ;;  %392 = vset.pattern.permute.xlu1 %v417_v4 }
   0x2   :  { %v22_v1 = vld [vmem:[%s530_s1] sm:$0xff]  ;;  %341 = vmatprep.subr.msk.mxu0 %vm104_vm0, %v30_v0  ;;  %v33_v6 = vld [vmem:[%s531_s2 + $0x10] sm:$0xff]  ;;  %v25_v7 = vld [vmem:[%s530_s1 + $0x18] sm:$0xff] }
   0x3   :  { %343 = vmatprep.mubr.msk.f32.mxu0 %vm79_vm1, %v22_v1  ;;  %342 = vmatpush3.msk.msra.mxu0 %vm104_vm0, %v30_v0  ;;  %v31_v5 = vld [vmem:[%s531_s2] sm:$0xff]  ;;  %v32_v9 = vld [vmem:[%s531_s2 + $0x8] sm:$0xff] }
   0x4   :  { %344 = vmatmul.mubr.msk.f32.vlgmr.msra.gmra.mrb[0].mxu0 %vm79_vm1, %v23_v2  ;;  %41 = vperm.xlu0 %391, %v31_v5   ;;  %v26_v8 = vld [vmem:[%s530_s1 + $0x20] sm:$0xff] }
   0x5   :  { %346 = vmatprep.mubr.msk.f32.mxu0 %vm79_vm1, %v24_v3  ;;  %51 = vperm.xlu1 %392, %v33_v6  }
   0x6   :  { %11 = vsyncpa [#allocation4], 0  ;;  %v34_v10 = vld [vmem:[%s531_s2 + $0x18] sm:$0xff]  ;;  %v27_v11 = vld [vmem:[%s530_s1 + $0x28] sm:$0xff]  ;;  %v418_v18 = vmov 0.0|0.0   ;;  %vm419_vm2 = vmmov 0   ;;  %v223_v57 = vstv %s533_s4 }
   0x7   :  { %v28_v12 = vld [vmem:[%s530_s1 + $0x30] sm:$0xff]  ;;  %v35_v13 = vld [vmem:[%s531_s2 + $0x20] sm:$0xff]  ;;  %v36_v14 = vld [vmem:[%s531_s2 + $0x28] sm:$0xff]  ;;  %374 = vmatprep.subr.bf16.mxu1 %v418_v18  ;;  %v420_v19 = vmov 0.0   ;;  %vm224_vm3 = vcmask 523264   ;;  %s421_s27 = smov [#allocation3]  }
   0x8   :  { %347 = vmatmul.mubr.msk.f32.gmra.mrb[2].mxu0 %vm79_vm1, %v25_v7  ;;  %46 = vperm.xlu0 %391, %v32_v9   ;;  %v29_v15 = vld [vmem:[%s530_s1 + $0x38] sm:$0xff]  ;;  %v37_v16 = vld [vmem:[%s531_s2 + $0x30] sm:$0xff]  ;;  %v221_v56 = vld [vmem:[%s532_s3] sm:$0x1]  ;;  %s305_s28 = sshll.u32 %s421_s27, 4  ;;  %s306_s28 = int_to_ptr.vmem [resolvable:$true] %s305_s28 }
   0x9   :  { %349 = vmatprep.mubr.msk.f32.mxu0 %vm79_vm1, %v26_v8  ;;  %56 = vperm.xlu1 %392, %v34_v10   ;;  %v38_v17 = vld [vmem:[%s531_s2 + $0x38] sm:$0xff]  ;;  %s393_s29 = scalar_lea.vmem %s306_s28, 16  ;;  %s397_s30 = scalar_lea.vmem %s306_s28, 32 }
   0xa   :  { %371 = vmatprep.mubr.msk.f32.mxu1 %vm419_vm2, %v420_v19  ;;  %p394_p0 = scmp.ne.s32.totalorder %s306_s28, %s393_s29  ;;  %p398_p1 = scmp.lt.s32.totalorder %s306_s28, %s306_s28 }
   0xb   :  { %p399_p2 = scmp.lt.s32.totalorder %s397_s30, %s393_s29 }
   0xc   :  { %350 = vmatmul.mubr.msk.f32.gmra.mrb[4].mxu0 %vm79_vm1, %v27_v11  ;;  %61 = vperm.xlu0 %391, %v35_v13  }
   0xd   :  { %352 = vmatprep.mubr.msk.f32.mxu0 %vm79_vm1, %v28_v12  ;;  %66 = vperm.xlu1 %392, %v36_v14   ;;  %p400_p3 = por %p399_p2, %p398_p1 }
   0xf   :  { %p401_p4 = pnand %p400_p3, %p394_p0 }
  0x10   :  { %353 = vmatmul.mubr.msk.f32.gmra.mrb[6].mxu0 %vm79_vm1, %v29_v15  ;;  %71 = vperm.xlu0 %391, %v37_v16  }
  0x11   :  { %76 = vperm.xlu1 %392, %v38_v17  }
  0x83   :  { %v42_v20 = vpop.permute.xlu0 %41 }
  0x84   :  { %v52_v21 = vpop.permute.xlu1 %51 }
  0x87   :  { %v47_v22 = vpop.permute.xlu0 %46 }
  0x88   :  { %v57_v23 = vpop.permute.xlu1 %56 }
  0x8b   :  { %v62_v36 = vpop.permute.xlu0 %61 }
  0x8c   :  { %v67_v33 = vpop.permute.xlu1 %66 }
  0x8f   :  { %v72_v48 = vpop.permute.xlu0 %71 }
  0x90   :  { %v77_v45 = vpop.permute.xlu1 %76 }
  0xd7   :  { %v345_v24 = vpop.f32.mrb[0].mxu0 }
  0xd8   :  { %v180_v25 = vadd.f32 %v345_v24, %v47_v22  ;;  %v174_v26 = vpop.f32.mrb[1].mxu0 }
  0xd9   :  { %v175_v27 = vadd.f32 %v174_v26, %v42_v20 }
  0xda   :  { %v214_v28 = vmax.f32 %v180_v25, 0.0 }
  0xdb   :  { %v213_v29 = vmax.f32 %v175_v27, 0.0  ;;  %v348_v30 = vpop.f32.mrb[2].mxu0 }
  0xdc   :  { %v190_v31 = vadd.f32 %v348_v30, %v57_v23  ;;  %v184_v32 = vpop.f32.mrb[3].mxu0 }
  0xdd   :  { %v185_v34 = vadd.f32 %v184_v32, %v52_v21  ;;  %v375_v35 = vpack.c.bf16 %v214_v28, %v213_v29 }
  0xde   :  { %v216_v37 = vmax.f32 %v190_v31, 0.0 }
  0xdf   :  { %v215_v38 = vmax.f32 %v185_v34, 0.0  ;;  %v351_v39 = vpop.f32.mrb[4].mxu0  ;;  %376 = vmatpush3.bf16.msra.mxu1 %v375_v35 }
  0xe0   :  { %v200_v40 = vadd.f32 %v351_v39, %v67_v33  ;;  %v194_v41 = vpop.f32.mrb[5].mxu0  ;;  %377 = vmatprep.subr.bf16.mxu1 %v418_v18 }
  0xe1   :  { %v378_v42 = vpack.c.bf16 %v216_v37, %v215_v38  ;;  %v195_v43 = vadd.f32 %v194_v41, %v62_v36 }
  0xe2   :  { %v218_v44 = vmax.f32 %v200_v40, 0.0 }
  0xe3   :  { %v217_v46 = vmax.f32 %v195_v43, 0.0  ;;  %v354_v47 = vpop.f32.mrb[6].mxu0  ;;  %379 = vmatpush3.bf16.msra.mxu1 %v378_v42 }
  0xe4   :  { %v210_v49 = vadd.f32 %v354_v47, %v77_v45  ;;  %v204_v50 = vpop.f32.mrb[7].mxu0  ;;  %380 = vmatprep.subr.bf16.mxu1 %v418_v18 }
  0xe5   :  { %v381_v51 = vpack.c.bf16 %v218_v44, %v217_v46  ;;  %v205_v52 = vadd.f32 %v204_v50, %v72_v48 }
  0xe6   :  { %v220_v53 = vmax.f32 %v210_v49, 0.0 }
  0xe7   :  { %v219_v54 = vmax.f32 %v205_v52, 0.0  ;;  %382 = vmatpush3.bf16.msra.mxu1 %v381_v51 }
  0xe8   :  { %383 = vmatprep.subr.bf16.mxu1 %v418_v18 }
  0xe9   :  { %v384_v55 = vpack.c.bf16 %v220_v53, %v219_v54 }
  0xeb   :  { %385 = vmatpush3.bf16.msra.mxu1 %v384_v55 }
  0xee   :  { %372 = vmatmul.mubr.msk.f32.vlgmr.msra.gmra.mrb[0].mxu1 %vm224_vm3, %v221_v56 }
 0x1c1   :  { %v294_v58 = vpop.f32.mrb[0].mxu1 }
 0x1c2   :  { %v295_v59 = vadd.f32 %v294_v58, %v223_v57  ;;  %v373_v60 = vpop.f32.mrb[1].mxu1 }
 0x1c4   :  { %298 = vst [vmem:[#allocation3] sm:$0x1] %v295_v59 }
 0x1c5   :  { %404 = shalt.err (!%p401_p4)
}
 0x1c6   :  { %s405_s7 = scalar_lea.hbm %s534_s5, 16 }
 0x1c7   :  { %p406_p5 = scmp.ne.s32.totalorder %s534_s5, %s405_s7  ;;  %p409_p6 = scmp.lt.u32.totalorder %s405_s7, %s534_s5 }
 0x1c9   :  { %p411_p7 = pnand %p409_p6, %p406_p5 }
 0x1cb   :  { %414 = shalt.err (!%p411_p7)
}
 0x1cc   :  { %308 = dma.vmem_to_hbm [thread:$0]  %s306_s28, 16, %s534_s5, [#allocation4]  }
 0x1cd   :  { %415 = dma.done.wait [#allocation4], 16  }
 0x1ce   :  { %416 = vsyncadd [#allocation4], 4294967280 }
 0x1cf   :  { %312 = vsyncpa [#allocation4], 1 }

</bundles_post_ra>
